<compile_context>
chip_gen: v7x
topology: tpu7x:2x2x1
jax: 0.10.0
libtpu: 0.0.40
codegen_flags: <defaults>
</compile_context>

<pallas_src>
import functools

import jax
import jax.numpy as jnp
from jax import lax
from jax.experimental import pallas as pl
from jax.experimental.pallas import tpu as pltpu

LANES = 128
SUBLANES = 8
ROW_UNIT = SUBLANES * LANES      # 1024 elements
CHUNK_ROWS = 256                 # rows folded per inner step (stays in vregs)


def _max_tile_rows():
    """Generation-specific streaming tile height (rows of 128 f32 lanes)."""
    try:
        kind = jax.devices()[0].device_kind.lower()
    except Exception:
        kind = ""
    # v7x: ~3.2 TB/s HBM -> bigger tiles to amortize per-step overhead
    # (2 MiB / operand tile; ~16-17 MiB double-buffered total, < 32 MiB limit).
    if "v7" in kind:
        return 4096
    # v6e / v5e: 1 MiB per operand tile (~8-9 MiB total) is already ~90% of
    # roofline; don't trade VMEM headroom for more.
    return 2048


def _as_rows(a, max_tile_rows):
    """Flatten to (rows, 128) with minimal padding.

    * element count multiple of 1024: free reshape, no HBM copy,
    * small arrays: pad to a multiple of 1024 (tiny copy, keeps rows % 8 == 0
      so the single full-array block needs no masking),
    * large arrays: pad at most to a multiple of 128 (copy only if the count
      is not already lane-aligned); ragged rows are masked in-kernel.
    Both operands of a pair are padded identically, so padding contributes
    exactly 0 to sum((a-b)^2).
    """
    flat = a.reshape(-1)
    n = flat.shape[0]
    if n % ROW_UNIT == 0:
        padded = n
    elif n <= max_tile_rows * LANES:
        padded = pl.cdiv(n, ROW_UNIT) * ROW_UNIT
    else:
        # TODO(synk): a flat 1-D layout with element-granularity masking would
        # avoid this copy for large sizes that are not lane-aligned.
        padded = pl.cdiv(n, LANES) * LANES
    if padded != n:
        flat = jnp.pad(flat, (0, padded - n))
    return flat.reshape(padded // LANES, LANES)


def _koopman_kernel(meta, grid_steps, inv_counts, scales, *refs):
    """Fused 3-way squared-difference reduction with in-kernel epilogue.

    meta:   static tuple of (tile_rows, rows, tiles) per pair.
    refs:   a0, b0, a1, b1, a2, b2,
            total_ref, recon_ref, pred_ref, lin_ref   (SMEM (1,) outputs),
            acc0, acc1, acc2                          (VMEM (8,128) scratch).
    """
    n_pairs = len(meta)
    in_refs = refs[: 2 * n_pairs]
    out_refs = refs[2 * n_pairs: 2 * n_pairs + 4]
    acc_refs = refs[2 * n_pairs + 4:]
    i = pl.program_id(0)

    @pl.when(i == 0)
    def _init():
        for acc in acc_refs:
            acc[...] = jnp.zeros_like(acc)

    for p, (tile_rows, rows, tiles) in enumerate(meta):
        a_ref = in_refs[2 * p]
        b_ref = in_refs[2 * p + 1]
        acc_ref = acc_refs[p]
        ragged = (rows % tile_rows) != 0

        def accumulate(a_ref=a_ref, b_ref=b_ref, acc_ref=acc_ref,
                       tile_rows=tile_rows, rows=rows, ragged=ragged):
            def fold(base, size):
                a = a_ref[pl.ds(base, size), :].astype(jnp.float32)
                b = b_ref[pl.ds(base, size), :].astype(jnp.float32)
                d = a - b
                if ragged:
                    # Mask BEFORE squaring: overhang VMEM is unspecified and
                    # could hold Inf/NaN.
                    rid = (i * tile_rows + base
                           + lax.broadcasted_iota(jnp.int32, d.shape, 0))
                    d = jnp.where(rid < rows, d, 0.0)
                dd = d * d
                return dd.reshape(size // SUBLANES, SUBLANES, LANES).sum(axis=0)

            chunk = min(CHUNK_ROWS, tile_rows)
            n_full = tile_rows // chunk
            rem = tile_rows - n_full * chunk   # multiple of 8 by construction

            def body(c, acc_val):
                base = pl.multiple_of(c * chunk, chunk)
                return acc_val + fold(base, chunk)

            part = lax.fori_loop(
                0, n_full, body,
                jnp.zeros((SUBLANES, LANES), jnp.float32), unroll=True)
            if rem:
                part = part + fold(n_full * chunk, rem)
            acc_ref[...] += part

        if tiles == grid_steps:
            accumulate()
        else:
            # This pair has fewer tiles than the grid: its index_map is
            # clamped (no re-DMA) and its compute is skipped past its range.
            pl.when(i < tiles)(accumulate)

    @pl.when(i == grid_steps - 1)
    def _finalize():
        pred_scale, recon_scale, lin_scale = scales
        recon = jnp.sum(acc_refs[0][...]) * inv_counts[0]
        pred = jnp.sum(acc_refs[1][...]) * inv_counts[1]
        lin = jnp.sum(acc_refs[2][...]) * inv_counts[2]
        total = pred_scale * pred + recon_scale * recon + lin_scale * lin
        out_refs[0][0] = total
        out_refs[1][0] = recon
        out_refs[2][0] = pred
        out_refs[3][0] = lin


def _make_idx_map(tiles, grid_steps):
    if tiles == grid_steps:
        return lambda i: (i, 0)
    last = tiles - 1
    return lambda i: (jnp.minimum(i, last), 0)


def _koopman_forward(pred_scale, recon_scale, linearity_scale, max_tile_rows,
                     x, zk1, y_pred, xk_tilde, y_encoded, y):
    pairs = [(xk_tilde, x), (y_pred, y), (zk1, y_encoded)]
    counts = [x.size, y.size, zk1.size]

    arrs = []
    meta = []
    for a, b in pairs:
        assert a.shape == b.shape, (a.shape, b.shape)
        a2 = _as_rows(a, max_tile_rows)
        b2 = _as_rows(b, max_tile_rows)
        rows = a2.shape[0]
        tile_rows = min(max_tile_rows, rows)
        tiles = pl.cdiv(rows, tile_rows)
        arrs += [a2, b2]
        meta.append((tile_rows, rows, tiles))

    grid_steps = max(t for _, _, t in meta)

    in_specs = []
    for tile_rows, rows, tiles in meta:
        spec = pl.BlockSpec((tile_rows, LANES), _make_idx_map(tiles, grid_steps))
        in_specs += [spec, spec]

    out_specs = [pl.BlockSpec(memory_space=pltpu.MemorySpace.SMEM)
                 for _ in range(4)]
    out_shape = [jax.ShapeDtypeStruct((1,), jnp.float32) for _ in range(4)]

    inv_counts = tuple(1.0 / float(c) for c in counts)
    scales = (float(pred_scale), float(recon_scale), float(linearity_scale))

    outs = pl.pallas_call(
        functools.partial(_koopman_kernel, tuple(meta), grid_steps,
                          inv_counts, scales),
        out_shape=out_shape,
        grid_spec=pltpu.PrefetchScalarGridSpec(
            num_scalar_prefetch=0,
            grid=(grid_steps,),
            in_specs=in_specs,
            out_specs=out_specs,
            scratch_shapes=[pltpu.VMEM((SUBLANES, LANES), jnp.float32)
                            for _ in range(len(meta))],
        ),
        compiler_params=pltpu.CompilerParams(
            dimension_semantics=("arbitrary",),
            vmem_limit_bytes=32 * 1024 * 1024,
        ),
    )(*arrs)

    total, recon, pred, lin = (o[0] for o in outs)
    return total, recon, pred, lin


class KoopmanLossPallas:
    """JAX/Pallas port of KoopmanLoss (forward pass)."""

    def __init__(self, pred_scale=1.0, recon_scale=1.0, linearity_scale=0.1):
        self.pred_scale = float(pred_scale)
        self.recon_scale = float(recon_scale)
        self.linearity_scale = float(linearity_scale)
        self._fn = jax.jit(functools.partial(
            _koopman_forward, self.pred_scale, self.recon_scale,
            self.linearity_scale, _max_tile_rows()))

    def __call__(self, x, zk, zk1, y_pred, xk_tilde, y_encoded, y):
        # zk is unused, matching the reference module.
        return self._fn(x, zk1, y_pred, xk_tilde, y_encoded, y)


if __name__ == "__main__":
    key = jax.random.PRNGKey(0)
    keys = jax.random.split(key, 7)

    # Image-like tensors (NCHW) and latent tensors.
    B, C, H, W = 2, 4, 16, 16
    HIDDEN = 32

    x = jax.random.normal(keys[0], (B, C, H, W), dtype=jnp.float32)
    zk = jax.random.normal(keys[1], (B, HIDDEN), dtype=jnp.float32)  # unused
    zk1 = jax.random.normal(keys[2], (B, HIDDEN), dtype=jnp.float32)
    y_pred = jax.random.normal(keys[3], (B, C, H, W), dtype=jnp.float32)
    xk_tilde = jax.random.normal(keys[4], (B, C, H, W), dtype=jnp.float32)
    y_encoded = jax.random.normal(keys[5], (B, HIDDEN), dtype=jnp.float32)
    y = jax.random.normal(keys[6], (B, C, H, W), dtype=jnp.float32)

    loss_mod = KoopmanLossPallas(pred_scale=1.0, recon_scale=1.0,
                                 linearity_scale=0.1)
    total, recon, pred, lin = loss_mod(x, zk, zk1, y_pred, xk_tilde,
                                       y_encoded, y)
    jax.block_until_ready((total, recon, pred, lin))

    ref_recon = jnp.mean((xk_tilde - x) ** 2)
    ref_pred = jnp.mean((y_pred - y) ** 2)
    ref_lin = jnp.mean((zk1 - y_encoded) ** 2)
    ref_total = 1.0 * ref_pred + 1.0 * ref_recon + 0.1 * ref_lin
    assert jnp.allclose(recon, ref_recon, rtol=1e-5, atol=1e-6)
    assert jnp.allclose(pred, ref_pred, rtol=1e-5, atol=1e-6)
    assert jnp.allclose(lin, ref_lin, rtol=1e-5, atol=1e-6)
    assert jnp.allclose(total, ref_total, rtol=1e-5, atol=1e-6)

    # Check 2: single full-array block with a remainder chunk in the inner
    # fold (1056 rows, not a multiple of 256).
    kb = jax.random.split(jax.random.PRNGKey(1), 6)
    shp2 = (8, 16, 33, 32)  # 135168 elements -> 1056 rows of 128 lanes
    x2 = jax.random.normal(kb[0], shp2, dtype=jnp.float32)
    y2 = jax.random.normal(kb[1], shp2, dtype=jnp.float32)
    yp2 = jax.random.normal(kb[2], shp2, dtype=jnp.float32)
    xt2 = jax.random.normal(kb[3], shp2, dtype=jnp.float32)
    z2 = jax.random.normal(kb[4], (B, HIDDEN), dtype=jnp.float32)
    ye2 = jax.random.normal(kb[5], (B, HIDDEN), dtype=jnp.float32)
    tot2, rec2, prd2, lin2 = loss_mod(x2, zk, z2, yp2, xt2, ye2, y2)
    jax.block_until_ready((tot2, rec2, prd2, lin2))
    assert jnp.allclose(rec2, jnp.mean((xt2 - x2) ** 2), rtol=5e-5, atol=1e-6)
    assert jnp.allclose(prd2, jnp.mean((yp2 - y2) ** 2), rtol=5e-5, atol=1e-6)
    assert jnp.allclose(lin2, jnp.mean((z2 - ye2) ** 2), rtol=5e-5, atol=1e-6)

    # Check 3: multi-tile grid with a ragged last tile (row masking) and
    # clamped index maps for the small latent pair (8200 rows total).
    kc = jax.random.split(jax.random.PRNGKey(2), 6)
    shp3 = (8, 128, 1025)  # 1,049,600 elements -> 8200 rows of 128 lanes
    x3 = jax.random.normal(kc[0], shp3, dtype=jnp.float32)
    y3 = jax.random.normal(kc[1], shp3, dtype=jnp.float32)
    yp3 = jax.random.normal(kc[2], shp3, dtype=jnp.float32)
    xt3 = jax.random.normal(kc[3], shp3, dtype=jnp.float32)
    z3 = jax.random.normal(kc[4], (B, HIDDEN), dtype=jnp.float32)
    ye3 = jax.random.normal(kc[5], (B, HIDDEN), dtype=jnp.float32)
    tot3, rec3, prd3, lin3 = loss_mod(x3, zk, z3, yp3, xt3, ye3, y3)
    jax.block_until_ready((tot3, rec3, prd3, lin3))
    assert jnp.allclose(rec3, jnp.mean((xt3 - x3) ** 2), rtol=1e-4, atol=1e-6)
    assert jnp.allclose(prd3, jnp.mean((yp3 - y3) ** 2), rtol=1e-4, atol=1e-6)
    assert jnp.allclose(lin3, jnp.mean((z3 - ye3) ** 2), rtol=1e-4, atol=1e-6)
    ref_tot3 = (1.0 * jnp.mean((yp3 - y3) ** 2)
                + 1.0 * jnp.mean((xt3 - x3) ** 2)
                + 0.1 * jnp.mean((z3 - ye3) ** 2))
    assert jnp.allclose(tot3, ref_tot3, rtol=1e-4, atol=1e-6)

    print("KERNEL_OK")
</pallas_src>

<mosaic_0001>
module attributes {stable_mosaic.version = 11 : i64} {
  func.func @_koopman_kernel(%arg0: i32, %arg1: memref<16x128xf32, #tpu.memory_space<vmem>>, %arg2: memref<16x128xf32, #tpu.memory_space<vmem>>, %arg3: memref<16x128xf32, #tpu.memory_space<vmem>>, %arg4: memref<16x128xf32, #tpu.memory_space<vmem>>, %arg5: memref<8x128xf32, #tpu.memory_space<vmem>>, %arg6: memref<8x128xf32, #tpu.memory_space<vmem>>, %arg7: memref<1xf32, #tpu.memory_space<smem>>, %arg8: memref<1xf32, #tpu.memory_space<smem>>, %arg9: memref<1xf32, #tpu.memory_space<smem>>, %arg10: memref<1xf32, #tpu.memory_space<smem>>, %arg11: memref<8x128xf32, #tpu.memory_space<vmem>>, %arg12: memref<8x128xf32, #tpu.memory_space<vmem>>, %arg13: memref<8x128xf32, #tpu.memory_space<vmem>>) attributes {dimension_semantics = [#tpu.dimension_semantics<arbitrary>], iteration_bounds = array<i64: 1>, scalar_prefetch = 0 : i64, scratch_operands = 3 : i64, tpu.core_type = #tpu.core_type<tc>, window_params = [{transform_indices = @transform_0, window_bounds = array<i64: 16, 128>}, {transform_indices = @transform_1, window_bounds = array<i64: 16, 128>}, {transform_indices = @transform_2, window_bounds = array<i64: 16, 128>}, {transform_indices = @transform_3, window_bounds = array<i64: 16, 128>}, {transform_indices = @transform_4, window_bounds = array<i64: 8, 128>}, {transform_indices = @transform_5, window_bounds = array<i64: 8, 128>}, {transform_indices = @transform_6, window_bounds = array<i64: 1>}, {transform_indices = @transform_7, window_bounds = array<i64: 1>}, {transform_indices = @transform_8, window_bounds = array<i64: 1>}, {transform_indices = @transform_9, window_bounds = array<i64: 1>}]} {
    %c0_i32 = arith.constant 0 : i32
    %0 = arith.cmpi eq, %arg0, %c0_i32 : i32
    %1 = arith.extui %0 : i1 to i32
    %c0_i32_0 = arith.constant 0 : i32
    %2 = arith.cmpi ne, %1, %c0_i32_0 : i32
    scf.if %2 {
      %cst_31 = arith.constant 0.000000e+00 : f32
      %51 = vector.broadcast %cst_31 : f32 to vector<8x128xf32>
      %c0_32 = arith.constant 0 : index
      %c0_33 = arith.constant 0 : index
      %52 = vector.load %arg11[%c0_32, %c0_33] : memref<8x128xf32, #tpu.memory_space<vmem>>, vector<8x128xf32>
      tpu.vector_store %arg11[%c0_32, %c0_33], %51 {strides = array<i32>} : memref<8x128xf32, #tpu.memory_space<vmem>>, vector<8x128xf32>,
      %cst_34 = arith.constant 0.000000e+00 : f32
      %53 = vector.broadcast %cst_34 : f32 to vector<8x128xf32>
      %c0_35 = arith.constant 0 : index
      %c0_36 = arith.constant 0 : index
      %54 = vector.load %arg12[%c0_35, %c0_36] : memref<8x128xf32, #tpu.memory_space<vmem>>, vector<8x128xf32>
      tpu.vector_store %arg12[%c0_35, %c0_36], %53 {strides = array<i32>} : memref<8x128xf32, #tpu.memory_space<vmem>>, vector<8x128xf32>,
      %cst_37 = arith.constant 0.000000e+00 : f32
      %55 = vector.broadcast %cst_37 : f32 to vector<8x128xf32>
      %c0_38 = arith.constant 0 : index
      %c0_39 = arith.constant 0 : index
      %56 = vector.load %arg13[%c0_38, %c0_39] : memref<8x128xf32, #tpu.memory_space<vmem>>, vector<8x128xf32>
      tpu.vector_store %arg13[%c0_38, %c0_39], %55 {strides = array<i32>} : memref<8x128xf32, #tpu.memory_space<vmem>>, vector<8x128xf32>,
    } else {
    }
    %cst = arith.constant 0.000000e+00 : f32
    %3 = vector.broadcast %cst : f32 to vector<8x128xf32>
    %c0_i32_1 = arith.constant 0 : i32
    %c16_i32 = arith.constant 16 : i32
    %4 = arith.muli %c0_i32_1, %c16_i32 : i32
    %5 = tpu.assume_multiple %4, 16 : i32
    %6 = arith.index_cast %5 : i32 to index
    %c0 = arith.constant 0 : index
    %7 = vector.load %arg1[%6, %c0] : memref<16x128xf32, #tpu.memory_space<vmem>>, vector<16x128xf32>
    %8 = arith.index_cast %5 : i32 to index
    %c0_2 = arith.constant 0 : index
    %9 = vector.load %arg2[%8, %c0_2] : memref<16x128xf32, #tpu.memory_space<vmem>>, vector<16x128xf32>
    %10 = arith.subf %7, %9 : vector<16x128xf32>
    %11 = arith.mulf %10, %10 : vector<16x128xf32>
    %12 = vector.shape_cast %11 : vector<16x128xf32> to vector<2x8x128xf32>
    %cst_3 = arith.constant dense<0.000000e+00> : vector<8x128xf32>
    %13 = vector.multi_reduction <add>, %12, %cst_3 [0] : vector<2x8x128xf32> to vector<8x128xf32>
    %14 = arith.addf %3, %13 : vector<8x128xf32>
    %c1_i32 = arith.constant 1 : i32
    %c0_4 = arith.constant 0 : index
    %c0_5 = arith.constant 0 : index
    %15 = vector.load %arg11[%c0_4, %c0_5] : memref<8x128xf32, #tpu.memory_space<vmem>>, vector<8x128xf32>
    %16 = arith.addf %15, %14 : vector<8x128xf32>
    %c0_6 = arith.constant 0 : index
    %c0_7 = arith.constant 0 : index
    %17 = vector.load %arg11[%c0_6, %c0_7] : memref<8x128xf32, #tpu.memory_space<vmem>>, vector<8x128xf32>
    tpu.vector_store %arg11[%c0_6, %c0_7], %16 {strides = array<i32>} : memref<8x128xf32, #tpu.memory_space<vmem>>, vector<8x128xf32>,
    %cst_8 = arith.constant 0.000000e+00 : f32
    %18 = vector.broadcast %cst_8 : f32 to vector<8x128xf32>
    %c0_i32_9 = arith.constant 0 : i32
    %c16_i32_10 = arith.constant 16 : i32
    %19 = arith.muli %c0_i32_9, %c16_i32_10 : i32
    %20 = tpu.assume_multiple %19, 16 : i32
    %21 = arith.index_cast %20 : i32 to index
    %c0_11 = arith.constant 0 : index
    %22 = vector.load %arg3[%21, %c0_11] : memref<16x128xf32, #tpu.memory_space<vmem>>, vector<16x128xf32>
    %23 = arith.index_cast %20 : i32 to index
    %c0_12 = arith.constant 0 : index
    %24 = vector.load %arg4[%23, %c0_12] : memref<16x128xf32, #tpu.memory_space<vmem>>, vector<16x128xf32>
    %25 = arith.subf %22, %24 : vector<16x128xf32>
    %26 = arith.mulf %25, %25 : vector<16x128xf32>
    %27 = vector.shape_cast %26 : vector<16x128xf32> to vector<2x8x128xf32>
    %cst_13 = arith.constant dense<0.000000e+00> : vector<8x128xf32>
    %28 = vector.multi_reduction <add>, %27, %cst_13 [0] : vector<2x8x128xf32> to vector<8x128xf32>
    %29 = arith.addf %18, %28 : vector<8x128xf32>
    %c1_i32_14 = arith.constant 1 : i32
    %c0_15 = arith.constant 0 : index
    %c0_16 = arith.constant 0 : index
    %30 = vector.load %arg12[%c0_15, %c0_16] : memref<8x128xf32, #tpu.memory_space<vmem>>, vector<8x128xf32>
    %31 = arith.addf %30, %29 : vector<8x128xf32>
    %c0_17 = arith.constant 0 : index
    %c0_18 = arith.constant 0 : index
    %32 = vector.load %arg12[%c0_17, %c0_18] : memref<8x128xf32, #tpu.memory_space<vmem>>, vector<8x128xf32>
    tpu.vector_store %arg12[%c0_17, %c0_18], %31 {strides = array<i32>} : memref<8x128xf32, #tpu.memory_space<vmem>>, vector<8x128xf32>,
    %cst_19 = arith.constant 0.000000e+00 : f32
    %33 = vector.broadcast %cst_19 : f32 to vector<8x128xf32>
    %c0_i32_20 = arith.constant 0 : i32
    %c8_i32 = arith.constant 8 : i32
    %34 = arith.muli %c0_i32_20, %c8_i32 : i32
    %35 = tpu.assume_multiple %34, 8 : i32
    %36 = arith.index_cast %35 : i32 to index
    %c0_21 = arith.constant 0 : index
    %37 = vector.load %arg5[%36, %c0_21] : memref<8x128xf32, #tpu.memory_space<vmem>>, vector<8x128xf32>
    %38 = arith.index_cast %35 : i32 to index
    %c0_22 = arith.constant 0 : index
    %39 = vector.load %arg6[%38, %c0_22] : memref<8x128xf32, #tpu.memory_space<vmem>>, vector<8x128xf32>
    %40 = arith.subf %37, %39 : vector<8x128xf32>
    %41 = arith.mulf %40, %40 : vector<8x128xf32>
    %42 = vector.shape_cast %41 : vector<8x128xf32> to vector<1x8x128xf32>
    %cst_23 = arith.constant dense<0.000000e+00> : vector<8x128xf32>
    %43 = vector.multi_reduction <add>, %42, %cst_23 [0] : vector<1x8x128xf32> to vector<8x128xf32>
    %44 = arith.addf %33, %43 : vector<8x128xf32>
    %c1_i32_24 = arith.constant 1 : i32
    %c0_25 = arith.constant 0 : index
    %c0_26 = arith.constant 0 : index
    %45 = vector.load %arg13[%c0_25, %c0_26] : memref<8x128xf32, #tpu.memory_space<vmem>>, vector<8x128xf32>
    %46 = arith.addf %45, %44 : vector<8x128xf32>
    %c0_27 = arith.constant 0 : index
    %c0_28 = arith.constant 0 : index
    %47 = vector.load %arg13[%c0_27, %c0_28] : memref<8x128xf32, #tpu.memory_space<vmem>>, vector<8x128xf32>
    tpu.vector_store %arg13[%c0_27, %c0_28], %46 {strides = array<i32>} : memref<8x128xf32, #tpu.memory_space<vmem>>, vector<8x128xf32>,
    %c0_i32_29 = arith.constant 0 : i32
    %48 = arith.cmpi eq, %arg0, %c0_i32_29 : i32
    %49 = arith.extui %48 : i1 to i32
    %c0_i32_30 = arith.constant 0 : i32
    %50 = arith.cmpi ne, %49, %c0_i32_30 : i32
    scf.if %50 {
      %c0_31 = arith.constant 0 : index
      %c0_32 = arith.constant 0 : index
      %51 = vector.load %arg11[%c0_31, %c0_32] : memref<8x128xf32, #tpu.memory_space<vmem>>, vector<8x128xf32>
      %52 = vector.shape_cast %51 : vector<8x128xf32> to vector<1x8x128xf32>
      %cst_33 = arith.constant dense<0.000000e+00> : vector<1xf32>
      %53 = vector.multi_reduction <add>, %52, %cst_33 [1, 2] : vector<1x8x128xf32> to vector<1xf32>
      %54 = vector.shape_cast %53 : vector<1xf32> to vector<1x1x1xf32>
      %55 = vector.extract %54[0, 0, 0] : f32 from vector<1x1x1xf32>
      %cst_34 = arith.constant 4.8828125E-4 : f32
      %56 = arith.mulf %55, %cst_34 : f32
      %c0_35 = arith.constant 0 : index
      %c0_36 = arith.constant 0 : index
      %57 = vector.load %arg12[%c0_35, %c0_36] : memref<8x128xf32, #tpu.memory_space<vmem>>, vector<8x128xf32>
      %58 = vector.shape_cast %57 : vector<8x128xf32> to vector<1x8x128xf32>
      %cst_37 = arith.constant dense<0.000000e+00> : vector<1xf32>
      %59 = vector.multi_reduction <add>, %58, %cst_37 [1, 2] : vector<1x8x128xf32> to vector<1xf32>
      %60 = vector.shape_cast %59 : vector<1xf32> to vector<1x1x1xf32>
      %61 = vector.extract %60[0, 0, 0] : f32 from vector<1x1x1xf32>
      %cst_38 = arith.constant 4.8828125E-4 : f32
      %62 = arith.mulf %61, %cst_38 : f32
      %c0_39 = arith.constant 0 : index
      %c0_40 = arith.constant 0 : index
      %63 = vector.load %arg13[%c0_39, %c0_40] : memref<8x128xf32, #tpu.memory_space<vmem>>, vector<8x128xf32>
      %64 = vector.shape_cast %63 : vector<8x128xf32> to vector<1x8x128xf32>
      %cst_41 = arith.constant dense<0.000000e+00> : vector<1xf32>
      %65 = vector.multi_reduction <add>, %64, %cst_41 [1, 2] : vector<1x8x128xf32> to vector<1xf32>
      %66 = vector.shape_cast %65 : vector<1xf32> to vector<1x1x1xf32>
      %67 = vector.extract %66[0, 0, 0] : f32 from vector<1x1x1xf32>
      %cst_42 = arith.constant 1.562500e-02 : f32
      %68 = arith.mulf %67, %cst_42 : f32
      %cst_43 = arith.constant 1.000000e+00 : f32
      %69 = arith.mulf %cst_43, %62 : f32
      %cst_44 = arith.constant 1.000000e+00 : f32
      %70 = arith.mulf %cst_44, %56 : f32
      %71 = arith.addf %69, %70 : f32
      %cst_45 = arith.constant 1.000000e-01 : f32
      %72 = arith.mulf %cst_45, %68 : f32
      %73 = arith.addf %71, %72 : f32
      %c0_46 = arith.constant 0 : index
      %74 = memref.load %arg7[%c0_46] : memref<1xf32, #tpu.memory_space<smem>>
      memref.store %73, %arg7[%c0_46] : memref<1xf32, #tpu.memory_space<smem>>
      %c0_47 = arith.constant 0 : index
      %75 = memref.load %arg8[%c0_47] : memref<1xf32, #tpu.memory_space<smem>>
      memref.store %56, %arg8[%c0_47] : memref<1xf32, #tpu.memory_space<smem>>
      %c0_48 = arith.constant 0 : index
      %76 = memref.load %arg9[%c0_48] : memref<1xf32, #tpu.memory_space<smem>>
      memref.store %62, %arg9[%c0_48] : memref<1xf32, #tpu.memory_space<smem>>
      %c0_49 = arith.constant 0 : index
      %77 = memref.load %arg10[%c0_49] : memref<1xf32, #tpu.memory_space<smem>>
      memref.store %68, %arg10[%c0_49] : memref<1xf32, #tpu.memory_space<smem>>
    } else {
    }
    return
  }
  func.func @transform_0(%arg0: i32) -> (i32, i32) {
    %c0_i32 = arith.constant 0 : i32
    %c0_i32_0 = arith.constant 0 : i32
    return %arg0, %c0_i32 : i32, i32
  }
  func.func @transform_1(%arg0: i32) -> (i32, i32) {
    %c0_i32 = arith.constant 0 : i32
    %c0_i32_0 = arith.constant 0 : i32
    return %arg0, %c0_i32 : i32, i32
  }
  func.func @transform_2(%arg0: i32) -> (i32, i32) {
    %c0_i32 = arith.constant 0 : i32
    %c0_i32_0 = arith.constant 0 : i32
    return %arg0, %c0_i32 : i32, i32
  }
  func.func @transform_3(%arg0: i32) -> (i32, i32) {
    %c0_i32 = arith.constant 0 : i32
    %c0_i32_0 = arith.constant 0 : i32
    return %arg0, %c0_i32 : i32, i32
  }
  func.func @transform_4(%arg0: i32) -> (i32, i32) {
    %c0_i32 = arith.constant 0 : i32
    %c0_i32_0 = arith.constant 0 : i32
    return %arg0, %c0_i32 : i32, i32
  }
  func.func @transform_5(%arg0: i32) -> (i32, i32) {
    %c0_i32 = arith.constant 0 : i32
    %c0_i32_0 = arith.constant 0 : i32
    return %arg0, %c0_i32 : i32, i32
  }
  func.func @transform_6(%arg0: i32) -> i32 {
    %c0_i32 = arith.constant 0 : i32
    %c0_i32_0 = arith.constant 0 : i32
    return %c0_i32 : i32
  }
  func.func @transform_7(%arg0: i32) -> i32 {
    %c0_i32 = arith.constant 0 : i32
    %c0_i32_0 = arith.constant 0 : i32
    return %c0_i32 : i32
  }
  func.func @transform_8(%arg0: i32) -> i32 {
    %c0_i32 = arith.constant 0 : i32
    %c0_i32_0 = arith.constant 0 : i32
    return %c0_i32 : i32
  }
  func.func @transform_9(%arg0: i32) -> i32 {
    %c0_i32 = arith.constant 0 : i32
    %c0_i32_0 = arith.constant 0 : i32
    return %c0_i32 : i32
  }
}

</mosaic_0001>

<bundles_post_ra>
// kernel: _koopman_forward.1
= control target key start
LH: loop header
LB: loop body
LE: loop exit
PB: predicated region body
PF: predicated region fallthrough
CT: control target
= control target key end

     0   :  { %15 = vsyncpa [#allocation6], 0  ;;  %s355_s0 = inlined_call_operand.vmem [shape: f32[16,128], index: 0, kind: input, shape index: {}]   ;;  %s356_s1 = inlined_call_operand.vmem [shape: f32[16,128], index: 1, kind: input, shape index: {}]   ;;  %s357_s2 = inlined_call_operand.vmem [shape: f32[16,128], index: 2, kind: input, shape index: {}]   ;;  %s358_s3 = inlined_call_operand.vmem [shape: f32[16,128], index: 3, kind: input, shape index: {}]   ;;  %s359_s4 = inlined_call_operand.vmem [shape: f32[8,128], index: 4, kind: input, shape index: {}]   ;;  %s360_s5 = inlined_call_operand.vmem [shape: f32[8,128], index: 5, kind: input, shape index: {}]   ;;  %s361_s6 = inlined_call_operand.hbm [shape: f32[1], index: 6, kind: output, shape index: {0}]   ;;  %s362_s7 = inlined_call_operand.hbm [shape: f32[1], index: 7, kind: output, shape index: {1}]   ;;  %s363_s8 = inlined_call_operand.hbm [shape: f32[1], index: 8, kind: output, shape index: {2}]   ;;  %s364_s9 = inlined_call_operand.hbm [shape: f32[1], index: 9, kind: output, shape index: {3}]  }
   0x1   :  { %16 = vsyncpa [#allocation8], 0  ;;  %v63_v0 = vld [vmem:[%s359_s4] sm:$0xff]  ;;  %v38_v4 = vld [vmem:[%s355_s0 + $0x8] sm:$0xff] }
   0x2   :  { %v64_v1 = vld [vmem:[%s360_s5] sm:$0xff]  ;;  %v40_v6 = vld [vmem:[%s356_s1 + $0x8] sm:$0xff] }
   0x3   :  { %v37_v2 = vld [vmem:[%s355_s0] sm:$0xff]  ;;  %v65_v3 = vsub.f32 %v63_v0, %v64_v1  ;;  %v42_v8 = vsub.f32 %v38_v4, %v40_v6  ;;  %v51_v10 = vld [vmem:[%s357_s2 + $0x8] sm:$0xff] }
   0x4   :  { %v39_v5 = vld [vmem:[%s356_s1] sm:$0xff]  ;;  %v53_v13 = vld [vmem:[%s358_s3 + $0x8] sm:$0xff] }
   0x5   :  { %v41_v7 = vsub.f32 %v37_v2, %v39_v5  ;;  %v50_v9 = vld [vmem:[%s357_s2] sm:$0xff]  ;;  %v66_v12 = vmul.f32 %v65_v3, %v65_v3 }
   0x6   :  { %v52_v11 = vld [vmem:[%s358_s3] sm:$0xff] }
   0x7   :  { %v54_v14 = vsub.f32 %v50_v9, %v52_v11 }
   0x8   :  { %17 = vsyncpa [#allocation11], 0  ;;  %v43_v15 = vmul.f32 %v41_v7, %v41_v7  ;;  %v44_v16 = vmul.f32 %v42_v8, %v42_v8  ;;  %v55_v17 = vsub.f32 %v51_v10, %v53_v13  ;;  %98 = vadd.xlane.f32.xlu1 %v66_v12  ;;  %s177_s12 = scalar_lea.hbm %s362_s7, 16 }
   0x9   :  { %v56_v18 = vmul.f32 %v54_v14, %v54_v14  ;;  %p178_p0 = scmp.ne.s32.totalorder %s362_s7, %s177_s12  ;;  %p181_p1 = scmp.lt.u32.totalorder %s177_s12, %s362_s7 }
   0xa   :  { %v45_v19 = vadd.f32 %v44_v16, %v43_v15  ;;  %v57_v20 = vmul.f32 %v55_v17, %v55_v17 }
   0xb   :  { %p183_p2 = pnand %p181_p1, %p178_p0 }
   0xc   :  { %76 = vadd.xlane.f32.xlu0 %v45_v19  ;;  %v58_v21 = vadd.f32 %v57_v20, %v56_v18 }
  0x10   :  { %87 = vadd.xlane.f32.xlu0 %v58_v21 }
  0x95   :  { %v99_v22 = vpop.xlane.xlu1 %98 }
  0x96   :  { %v100_v23 = vrot.slane %v99_v22, 4 }
  0x98   :  { %v101_v24 = vadd.f32 %v100_v23, %v99_v22 }
  0x99   :  { %v77_v25 = vpop.xlane.xlu0 %76 }
  0x9a   :  { %v78_v26 = vrot.slane %v77_v25, 4  ;;  %v102_v28 = vrot.slane %v101_v24, 2 }
  0x9c   :  { %v79_v27 = vadd.f32 %v78_v26, %v77_v25  ;;  %v103_v34 = vadd.f32 %v102_v28, %v101_v24 }
  0x9d   :  { %v88_v29 = vpop.xlane.xlu0 %87 }
  0x9e   :  { %v80_v30 = vrot.slane %v79_v27, 2  ;;  %v89_v31 = vrot.slane %v88_v29, 4  ;;  %v104_v39 = vrot.slane %v103_v34, 1 }
  0xa0   :  { %v90_v32 = vadd.f32 %v89_v31, %v88_v29  ;;  %v81_v33 = vadd.f32 %v80_v30, %v79_v27  ;;  %v105_v42 = vadd.f32 %v104_v39, %v103_v34 }
  0xa2   :  { %v91_v35 = vrot.slane %v90_v32, 2  ;;  %v82_v36 = vrot.slane %v81_v33, 1 }
  0xa4   :  { %v92_v37 = vadd.f32 %v91_v35, %v90_v32  ;;  %v83_v38 = vadd.f32 %v82_v36, %v81_v33 }
  0xa6   :  { %167 = vpush %v83_v38  ;;  %v93_v40 = vrot.slane %v92_v37, 1 }
  0xa8   :  { %v94_v41 = vadd.f32 %v93_v40, %v92_v37 }
  0xaa   :  { %169 = vpush %v94_v41 }
  0xab   :  { %171 = vpush %v105_v42 }
  0xd7   :  { %s168_s1 = spop %167 }
  0xd8   :  { %s85_s2 = smul.f32 0.00048828125, %s168_s1 }
  0xda   :  { %114 = sst [smem:[#allocation7]] %s85_s2 }
  0xdb   :  { %s170_s3 = spop %169 }
  0xdc   :  { %s96_s26 = smul.f32 0.00048828125, %s170_s3  ;;  %s172_s27 = spop %171 }
  0xdd   :  { %s107_s28 = smul.f32 0.015625, %s172_s27 }
  0xde   :  { %s108_s29 = sadd.f32 %s96_s26, %s85_s2 }
  0xdf   :  { %s109_s30 = smul.f32 0.1, %s107_s28  ;;  %116 = sst [smem:[#allocation9]] %s96_s26 }
  0xe0   :  { %186 = shalt.err (!%p183_p2)
}
  0xe1   :  { %s223_s17 = smov [#allocation7]   ;;  %s110_s20 = sadd.f32 %s109_s30, %s108_s29 }
  0xe2   :  { %134 = dma.smem_to_hbm %s223_s17, 16, %s362_s7, [#allocation8]  }
  0xe3   :  { %s187_s21 = scalar_lea.hbm %s363_s8, 16 }
  0xe4   :  { %p188_p3 = scmp.ne.s32.totalorder %s363_s8, %s187_s21  ;;  %p191_p4 = scmp.lt.u32.totalorder %s187_s21, %s363_s8 }
  0xe6   :  { %p193_p5 = pnand %p191_p4, %p188_p3 }
  0xe8   :  { %196 = shalt.err (!%p193_p5)
}
  0xe9   :  { %s224_s25 = smov [#allocation9]   ;;  %112 = sst [smem:[#allocation5]] %s110_s20 }
  0xea   :  { %142 = dma.smem_to_hbm %s224_s25, 16, %s363_s8, [#allocation8]  }
  0xeb   :  { %s197_s26 = scalar_lea.hbm %s361_s6, 16 }
  0xec   :  { %p198_p6 = scmp.ne.s32.totalorder %s361_s6, %s197_s26  ;;  %p201_p7 = scmp.lt.u32.totalorder %s197_s26, %s361_s6 }
  0xee   :  { %p203_p8 = pnand %p201_p7, %p198_p6 }
  0xf0   :  { %206 = shalt.err (!%p203_p8)
}
  0xf1   :  { %s225_s11 = smov [#allocation5]   ;;  %118 = sst [smem:[#allocation10]] %s107_s28 }
  0xf2   :  { %126 = dma.smem_to_hbm %s225_s11, 16, %s361_s6, [#allocation6]  }
  0xf3   :  { %s207_s15 = scalar_lea.hbm %s364_s9, 16 }
  0xf4   :  { %p208_p9 = scmp.ne.s32.totalorder %s364_s9, %s207_s15  ;;  %p211_p10 = scmp.lt.u32.totalorder %s207_s15, %s364_s9 }
  0xf6   :  { %p213_p11 = pnand %p211_p10, %p208_p9 }
  0xf8   :  { %216 = shalt.err (!%p213_p11)
}
  0xf9   :  { %s226_s20 = smov [#allocation10]  }
  0xfa   :  { %150 = dma.smem_to_hbm %s226_s20, 16, %s364_s9, [#allocation11]  }
  0xfb   :  { %217 = dma.done.wait [#allocation6], 16  }
  0xfc   :  { %218 = vsyncadd [#allocation6], 4294967280 }
  0xfd   :  { %219 = dma.done.wait [#allocation8], 32  }
  0xfe   :  { %220 = vsyncadd [#allocation8], 4294967264 }
  0xff   :  { %221 = dma.done.wait [#allocation11], 16  }
 0x100   :  { %222 = vsyncadd [#allocation11], 4294967280 }
 0x101   :  { %163 = sfence }
 0x102   :  { %164 = vsyncpa [#allocation6], 1 }
 0x103   :  { %165 = vsyncpa [#allocation8], 1 }
 0x104   :  { %166 = vsyncpa [#allocation11], 1 }

</bundles_post_ra>
